<compile_context>
chip_gen: v6e
topology: v6e:2x2x1
jax: 0.10.0
libtpu: 0.0.40
codegen_flags: <defaults>
</compile_context>

<pallas_src>
import math

import numpy as np
import jax
import jax.numpy as jnp
from jax.experimental import pallas as pl
from jax.experimental.pallas import tpu as pltpu


# -----------------------------------------------------------------------------
# Pallas kernel
# -----------------------------------------------------------------------------
def _make_sabp_kernel(score_col):
    """score_col == C (index of the raw score column inside the packed slab)."""

    def kernel(x_ref, ahat_ref, h_ref, wx_ref, brow_ref, out_ref):
        # The single Ahat pass: (TM, NP) bf16 @ (NP, 128) bf16 -> f32 accumulate.
        ah = jnp.dot(ahat_ref[...], h_ref[...],
                     preferred_element_type=jnp.float32) + brow_ref[...]
        # x-side projection (x @ Wfc[C:] packed into column score_col+2).
        xproj = jnp.dot(x_ref[...], wx_ref[...],
                        preferred_element_type=jnp.float32)
        score = ah[:, score_col:score_col + 1]        # (TM, 1), bias included
        # Packed lane-dense output slab (128 wide, single unmasked store).
        out_ref[...] = x_ref[...] * jnp.tanh(score) + ah + xproj

    return kernel


def _round_up(a, b):
    return ((a + b - 1) // b) * b


def sabp_pallas_core(x, ahat, params, tm=256):
    """Runs the fused kernel; returns the (N, 128) packed result slab (f32)."""
    N, C = x.shape
    CP = max(128, _round_up(C + 3, 128))              # padded lane width

    # Row-tile choice: 256 is MXU aligned on v5e (128) and v6e/v7x (256) and
    # keeps Ahat double-buffers within the default scoped VMEM on all gens
    # (incl. v7x's 64 MiB).  On v6e/v5e (128 MiB VMEM) `tm` can be swept upward.
    if N <= tm:
        TM = NP = _round_up(max(N, 16), 16)
    else:
        TM = tm
        NP = _round_up(N, TM)

    Wg, bg = params["Wg"], params["bg"]
    Ws, bs = params["Ws"], params["bs"]
    Wfc, bfc = params["Wfc"], params["bfc"]
    wfc_a = Wfc[:C, :]                                # (C, 1)
    wfc_b = Wfc[C:, :]                                # (C, 1)

    # Fused Ahat-side projections (tiny (N,C)x(C,2) matmuls, done in glue).
    h_cols = jnp.concatenate([x @ Ws, x @ (Wg @ wfc_a)], axis=1)     # (N, 2)
    H = jnp.zeros((NP, CP), jnp.float32).at[:N, C:C + 2].set(h_cols)
    H = H.astype(jnp.bfloat16)

    # Padded inputs; Ahat in bf16 (dominant traffic), x kept f32 (tiny).
    x_pad = jnp.zeros((NP, CP), jnp.float32).at[:N, :C].set(x)
    ahat_pad = (jnp.zeros((NP, NP), jnp.float32)
                .at[:N, :N].set(ahat).astype(jnp.bfloat16))

    # x-side weight: only column C+2 (Wfc[C:]) is non-zero.
    W_x = jnp.zeros((CP, CP), jnp.float32).at[:C, C + 2].set(wfc_b[:, 0])

    # Lane-dense bias row (replaces scalar (1,1) VMEM blocks).
    brow = (jnp.zeros((1, CP), jnp.float32)
            .at[0, C].set(bs[0, 0])
            .at[0, C + 1].set((bg @ wfc_a)[0, 0])
            .at[0, C + 2].set(bfc[0, 0]))

    out = pl.pallas_call(
        _make_sabp_kernel(C),
        out_shape=jax.ShapeDtypeStruct((NP, CP), jnp.float32),
        grid=(NP // TM,),
        in_specs=[
            pl.BlockSpec((TM, CP), lambda i: (i, 0)),   # x (row tiled)
            pl.BlockSpec((TM, NP), lambda i: (i, 0)),   # Ahat (row tiled)
            pl.BlockSpec((NP, CP), lambda i: (0, 0)),   # H   (resident)
            pl.BlockSpec((CP, CP), lambda i: (0, 0)),   # W_x (resident)
            pl.BlockSpec((1, CP), lambda i: (0, 0)),    # bias row (resident)
        ],
        out_specs=pl.BlockSpec((TM, CP), lambda i: (i, 0)),
        compiler_params=pltpu.CompilerParams(
            dimension_semantics=("parallel",)),         # v7x: 2 TCs split rows
    )(x_pad, ahat_pad, H, W_x, brow)
    return out[:N]


# -----------------------------------------------------------------------------
# Glue: GCN normalization, MI reduction, top-k pooling, edge filtering.
# -----------------------------------------------------------------------------
def gcn_norm_dense(edge_index, num_nodes, edge_weight=None):
    """Dense D^-1/2 (A + I) D^-1/2 with A[dst, src] = edge_weight.

    Row sums of A[dst, src] equal PyG's scatter-on-col degree, so this matches
    gcn_norm for directed inputs as well.
    """
    row, col = edge_index[0], edge_index[1]             # src, dst
    if edge_weight is None:
        edge_weight = jnp.ones(row.shape[0], jnp.float32)
    A = jnp.zeros((num_nodes, num_nodes), jnp.float32).at[col, row].add(edge_weight)
    A = A + jnp.eye(num_nodes, dtype=jnp.float32)        # add self-loops (w=1)
    deg = A.sum(axis=1)
    dinv = jnp.where(deg > 0, 1.0 / jnp.sqrt(deg), 0.0)
    return dinv[:, None] * A * dinv[None, :]


def filter_adj_np(edge_index, edge_attr, perm, num_nodes):
    """Keep edges whose endpoints are both in perm; remap node indices."""
    mask = np.full(num_nodes, -1, dtype=np.int64)
    mask[np.asarray(perm)] = np.arange(len(perm))
    row, col = np.asarray(edge_index)
    nrow, ncol = mask[row], mask[col]
    keep = (nrow >= 0) & (ncol >= 0)
    new_ei = np.stack([nrow[keep], ncol[keep]]).astype(np.int32)
    new_ea = None if edge_attr is None else np.asarray(edge_attr)[keep]
    return new_ei, new_ea


def sabp_forward(params, x, edge_index, edge_attr=None, batch=None,
                 ratio=0.8, perm_key=None):
    N, C = x.shape
    if batch is None:
        batch = jnp.zeros((N,), jnp.int32)
    if perm_key is None:
        perm_key = jax.random.PRNGKey(1)

    rnd_perm = jax.random.permutation(perm_key, N)       # randperm(N)
    ahat = gcn_norm_dense(edge_index, N, edge_attr)

    out = sabp_pallas_core(x, ahat, params)              # (N, 128) packed slab
    xsc = out[:, :C]                                     # x * tanh(score)
    score = out[:, C]                                    # score conv output
    e_fc = out[:, C + 1]                                 # embed @ Wfc[:C] (+bias)
    t_b = out[:, C + 2]                                  # x @ Wfc[C:] + bfc

    # joint = fc(cat(embed, x)); margin = fc(cat(embed, x[randperm])).
    # The permutation commutes with the row-wise projection, so permute t_b.
    joint = (e_fc + t_b)[:, None]
    margin = (e_fc + t_b[rnd_perm])[:, None]

    # F.normalize(v, dim=1) on (N,1): v / max(|v|, 1e-12)  (matches reference).
    eps = 1e-12
    joint_n = joint / jnp.maximum(jnp.abs(joint), eps)
    margin_n = margin / jnp.maximum(jnp.abs(margin), eps)
    mi_est = jnp.mean(joint_n) - jnp.log(jnp.mean(jnp.exp(margin_n)))

    # top-k pooling (batch=None => single graph).
    # TODO(synk): per-graph (batched) top-k not implemented; also many small
    # graphs could be stacked along a leading grid axis of one pallas_call.
    k = int(math.ceil(ratio * N))
    perm = jnp.argsort(-score)[:k]

    x_out = xsc[perm]                                    # x[perm]*tanh(score[perm])
    batch_out = batch[perm]
    new_ei, new_ea = filter_adj_np(edge_index, edge_attr, perm, num_nodes=N)
    return x_out, new_ei, new_ea, batch_out, perm, mi_est


# -----------------------------------------------------------------------------
# Pure-JAX reference (f32, dense Ahat) for a tolerance check.
# -----------------------------------------------------------------------------
def sabp_reference_dense(params, x, ahat):
    embed = ahat @ (x @ params["Wg"]) + params["bg"]
    score = (ahat @ (x @ params["Ws"]) + params["bs"])[:, 0]
    xsc = x * jnp.tanh(score)[:, None]
    return score, xsc


def init_params(key, in_channels):
    C = in_channels
    ks = jax.random.split(key, 6)
    s = 1.0 / math.sqrt(C)
    return {
        "Wg": jax.random.uniform(ks[0], (C, C), jnp.float32, -s, s),
        "bg": jax.random.uniform(ks[1], (1, C), jnp.float32, -s, s),
        "Ws": jax.random.uniform(ks[2], (C, 1), jnp.float32, -s, s),
        "bs": jax.random.uniform(ks[3], (1, 1), jnp.float32, -s, s),
        "Wfc": jax.random.uniform(ks[4], (2 * C, 1), jnp.float32, -s, s),
        "bfc": jax.random.uniform(ks[5], (1, 1), jnp.float32, -s, s),
    }


if __name__ == "__main__":
    N, C = 16, 8
    key = jax.random.PRNGKey(0)
    k_param, k_x, k_perm = jax.random.split(key, 3)

    params = init_params(k_param, C)
    x = jax.random.normal(k_x, (N, C), jnp.float32)

    # small ring graph, edges in both directions
    src = np.arange(N)
    dst = (src + 1) % N
    edge_index = jnp.asarray(
        np.stack([np.concatenate([src, dst]), np.concatenate([dst, src])]),
        dtype=jnp.int32)

    x_out, new_ei, new_ea, batch_out, perm, mi_est = sabp_forward(
        params, x, edge_index, edge_attr=None, batch=None,
        ratio=0.8, perm_key=k_perm)
    jax.block_until_ready((x_out, batch_out, perm, mi_est))

    # sanity vs. f32 dense reference (loose tol: Ahat/H fed in bf16).
    ahat = gcn_norm_dense(edge_index, N, None)
    score_ref, xsc_ref = sabp_reference_dense(params, x, ahat)
    out_slab = sabp_pallas_core(x, ahat, params)
    assert np.allclose(np.asarray(out_slab[:, C]), np.asarray(score_ref),
                       rtol=5e-2, atol=2e-2)
    assert np.allclose(np.asarray(out_slab[:, :C]), np.asarray(xsc_ref),
                       rtol=5e-2, atol=2e-2)
    assert x_out.shape == (int(math.ceil(0.8 * N)), C)
    assert np.isfinite(float(mi_est))
    print("KERNEL_OK")
</pallas_src>

<mosaic_0001>
module attributes {stable_mosaic.version = 11 : i64} {
  func.func @kernel(%arg0: i32, %arg1: memref<16x128xf32, #tpu.memory_space<vmem>>, %arg2: memref<16x16xbf16, #tpu.memory_space<vmem>>, %arg3: memref<16x128xbf16, #tpu.memory_space<vmem>>, %arg4: memref<128x128xf32, #tpu.memory_space<vmem>>, %arg5: memref<1x128xf32, #tpu.memory_space<vmem>>, %arg6: memref<16x128xf32, #tpu.memory_space<vmem>>) attributes {dimension_semantics = [#tpu.dimension_semantics<parallel>], iteration_bounds = array<i64: 1>, scalar_prefetch = 0 : i64, scratch_operands = 0 : i64, tpu.core_type = #tpu.core_type<tc>, window_params = [{transform_indices = @transform_0, window_bounds = array<i64: 16, 128>}, {transform_indices = @transform_1, window_bounds = array<i64: 16, 16>}, {pipeline_mode = #tpu.pipeline_mode<synchronous>, transform_indices = @transform_2, window_bounds = array<i64: 16, 128>}, {pipeline_mode = #tpu.pipeline_mode<synchronous>, transform_indices = @transform_3, window_bounds = array<i64: 128, 128>}, {pipeline_mode = #tpu.pipeline_mode<synchronous>, transform_indices = @transform_4, window_bounds = array<i64: 1, 128>}, {transform_indices = @transform_5, window_bounds = array<i64: 16, 128>}]} {
    %c0 = arith.constant 0 : index
    %c0_0 = arith.constant 0 : index
    %0 = vector.load %arg2[%c0, %c0_0] : memref<16x16xbf16, #tpu.memory_space<vmem>>, vector<16x16xbf16>
    %c0_1 = arith.constant 0 : index
    %c0_2 = arith.constant 0 : index
    %1 = vector.load %arg3[%c0_1, %c0_2] : memref<16x128xbf16, #tpu.memory_space<vmem>>, vector<16x128xbf16>
    %cst = arith.constant dense<0.000000e+00> : vector<16x128xf32>
    %2 = tpu.matmul %0, %1, %cst {dimension_numbers = #tpu.dot_dimension_numbers<[1], [0], [0], [1], [0, 0, 1, 1], [], []>} : vector<16x16xbf16>, vector<16x128xbf16>, vector<16x128xf32> -> vector<16x128xf32>
    %c0_3 = arith.constant 0 : index
    %c0_4 = arith.constant 0 : index
    %3 = vector.load %arg5[%c0_3, %c0_4] : memref<1x128xf32, #tpu.memory_space<vmem>>, vector<1x128xf32>
    %4 = vector.broadcast %3 : vector<1x128xf32> to vector<16x128xf32>
    %5 = arith.addf %2, %4 : vector<16x128xf32>
    %c0_5 = arith.constant 0 : index
    %c0_6 = arith.constant 0 : index
    %6 = vector.load %arg1[%c0_5, %c0_6] : memref<16x128xf32, #tpu.memory_space<vmem>>, vector<16x128xf32>
    %c0_7 = arith.constant 0 : index
    %c0_8 = arith.constant 0 : index
    %7 = vector.load %arg4[%c0_7, %c0_8] : memref<128x128xf32, #tpu.memory_space<vmem>>, vector<128x128xf32>
    %cst_9 = arith.constant dense<0.000000e+00> : vector<16x128xf32>
    %8 = tpu.matmul %6, %7, %cst_9 {dimension_numbers = #tpu.dot_dimension_numbers<[1], [0], [0], [1], [0, 0, 1, 1], [], []>} : vector<16x128xf32>, vector<128x128xf32>, vector<16x128xf32> -> vector<16x128xf32>
    %9 = vector.extract_strided_slice %5 {offsets = [0, 8], sizes = [16, 1], strides = [1, 1]} : vector<16x128xf32> to vector<16x1xf32>
    %c0_10 = arith.constant 0 : index
    %c0_11 = arith.constant 0 : index
    %10 = vector.load %arg1[%c0_10, %c0_11] : memref<16x128xf32, #tpu.memory_space<vmem>>, vector<16x128xf32>
    %11 = math.tanh %9 : vector<16x1xf32>
    %12 = vector.broadcast %11 : vector<16x1xf32> to vector<16x128xf32>
    %13 = arith.mulf %10, %12 : vector<16x128xf32>
    %14 = arith.addf %13, %5 : vector<16x128xf32>
    %15 = arith.addf %14, %8 : vector<16x128xf32>
    %c0_12 = arith.constant 0 : index
    %c0_13 = arith.constant 0 : index
    %16 = vector.load %arg6[%c0_12, %c0_13] : memref<16x128xf32, #tpu.memory_space<vmem>>, vector<16x128xf32>
    tpu.vector_store %arg6[%c0_12, %c0_13], %15 {strides = array<i32>} : memref<16x128xf32, #tpu.memory_space<vmem>>, vector<16x128xf32>,
    return
  }
  func.func @transform_0(%arg0: i32) -> (i32, i32) {
    %c0_i32 = arith.constant 0 : i32
    %c0_i32_0 = arith.constant 0 : i32
    return %arg0, %c0_i32 : i32, i32
  }
  func.func @transform_1(%arg0: i32) -> (i32, i32) {
    %c0_i32 = arith.constant 0 : i32
    %c0_i32_0 = arith.constant 0 : i32
    return %arg0, %c0_i32 : i32, i32
  }
  func.func @transform_2(%arg0: i32) -> (i32, i32) {
    %c0_i32 = arith.constant 0 : i32
    %c0_i32_0 = arith.constant 0 : i32
    %c0_i32_1 = arith.constant 0 : i32
    return %c0_i32, %c0_i32_0 : i32, i32
  }
  func.func @transform_3(%arg0: i32) -> (i32, i32) {
    %c0_i32 = arith.constant 0 : i32
    %c0_i32_0 = arith.constant 0 : i32
    %c0_i32_1 = arith.constant 0 : i32
    return %c0_i32, %c0_i32_0 : i32, i32
  }
  func.func @transform_4(%arg0: i32) -> (i32, i32) {
    %c0_i32 = arith.constant 0 : i32
    %c0_i32_0 = arith.constant 0 : i32
    %c0_i32_1 = arith.constant 0 : i32
    return %c0_i32, %c0_i32_0 : i32, i32
  }
  func.func @transform_5(%arg0: i32) -> (i32, i32) {
    %c0_i32 = arith.constant 0 : i32
    %c0_i32_0 = arith.constant 0 : i32
    return %arg0, %c0_i32 : i32, i32
  }
}

</mosaic_0001>

<bundles_post_ra>
// kernel: tpu_custom_call.1
= control target key start
LH: loop header
LB: loop body
LE: loop exit
PB: predicated region body
PF: predicated region fallthrough
CT: control target
= control target key end

     0   :  { %10 = vsyncpa [#allocation3], 0  ;;  %s543_s0 = inlined_call_operand.hbm [shape: f32[16,128], index: 0, kind: input, shape index: {}]   ;;  %s544_s1 = inlined_call_operand.hbm [shape: bf16[16,16], index: 1, kind: input, shape index: {}]   ;;  %s545_s2 = inlined_call_operand.hbm [shape: bf16[16,128], index: 2, kind: input, shape index: {}]   ;;  %s546_s3 = inlined_call_operand.hbm [shape: f32[128,128], index: 3, kind: input, shape index: {}]   ;;  %s547_s4 = inlined_call_operand.vmem [shape: f32[1,128], index: 4, kind: input, shape index: {}]   ;;  %s548_s5 = inlined_call_operand.hbm [shape: f32[16,128], index: 5, kind: output, shape index: {}]  }
   0x1   :  { %11 = vsyncpa [#allocation6], 0 }
   0x2   :  { %12 = vsyncpa [#allocation9], 0 }
   0x3   :  { %13 = vsyncpa [#allocation4], 0  ;;  %s468_s18 = smov [#allocation5]  }
   0x4   :  { %s31_s19 = sshll.u32 %s468_s18, 4  ;;  %s32_s19 = int_to_ptr.vmem [resolvable:$true] %s31_s19 }
   0x5   :  { %s368_s20 = scalar_lea.vmem %s32_s19, 128  ;;  %p373_p1 = scmp.lt.s32.totalorder %s32_s19, %s32_s19 }
   0x6   :  { %p369_p0 = scmp.ne.s32.totalorder %s32_s19, %s368_s20  ;;  %p374_p2 = scmp.lt.s32.totalorder %s368_s20, %s368_s20 }
   0x8   :  { %p375_p3 = por %p374_p2, %p373_p1 }
   0xa   :  { %p376_p4 = pnand %p375_p3, %p369_p0 }
   0xc   :  { %379 = shalt.err (!%p376_p4)
}
   0xd   :  { %s469_s21 = smov 64   ;;  %s470_s22 = smov 4  }
   0xe   :  { %37 = dma.hbm_to_vmem [thread:$0]  %s544_s1, 128, %s32_s19, [#allocation6], %s469_s21, %s469_s21, %s470_s22  }
   0xf   :  { %s471_s25 = smov [#allocation2]  }
  0x10   :  { %s19_s26 = sshll.u32 %s471_s25, 4  ;;  %s20_s26 = int_to_ptr.vmem [resolvable:$true] %s19_s26 }
  0x11   :  { %s388_s27 = scalar_lea.vmem %s20_s26, 256  ;;  %p393_p6 = scmp.lt.s32.totalorder %s20_s26, %s20_s26 }
  0x12   :  { %p389_p5 = scmp.ne.s32.totalorder %s20_s26, %s388_s27  ;;  %p394_p7 = scmp.lt.s32.totalorder %s388_s27, %s388_s27 }
  0x14   :  { %p395_p8 = por %p394_p7, %p393_p6 }
  0x16   :  { %p396_p9 = pnand %p395_p8, %p389_p5 }
  0x18   :  { %399 = shalt.err (!%p396_p9)
}
  0x19   :  { %s472_s28 = smov 128   ;;  %s473_s29 = smov 8  }
  0x1a   :  { %25 = dma.hbm_to_vmem [thread:$0]  %s543_s0, 256, %s20_s26, [#allocation3], %s472_s28, %s472_s28, %s473_s29  }
  0x1b   :  { %s474_s1 = smov [#allocation7]   ;;  %s475_s8 = smov [#allocation8]  }
  0x1c   :  { %s43_s7 = sshll.u32 %s474_s1, 4  ;;  %s55_s9 = sshll.u32 %s475_s8, 4  ;;  %s44_s7 = int_to_ptr.vmem [resolvable:$true] %s43_s7  ;;  %s56_s9 = int_to_ptr.vmem [resolvable:$true] %s55_s9 }
  0x1d   :  { %s408_s10 = scalar_lea.vmem %s44_s7, 128  ;;  %p413_p11 = scmp.lt.s32.totalorder %s44_s7, %s44_s7 }
  0x1e   :  { %p409_p10 = scmp.ne.s32.totalorder %s44_s7, %s408_s10  ;;  %p414_p12 = scmp.lt.s32.totalorder %s408_s10, %s408_s10 }
  0x20   :  { %p415_p13 = por %p414_p12, %p413_p11 }
  0x22   :  { %p416_p0 = pnand %p415_p13, %p409_p10 }
  0x24   :  { %419 = shalt.err (!%p416_p0)
}
  0x25   :  { %49 = dma.hbm_to_vmem [thread:$0]  %s545_s2, 128, %s44_s7, [#allocation6], %s469_s21, %s469_s21, %s470_s22  }
  0x26   :  { %s428_s0 = scalar_lea.vmem %s56_s9, 2048  ;;  %p433_p2 = scmp.lt.s32.totalorder %s56_s9, %s56_s9 }
  0x27   :  { %p429_p1 = scmp.ne.s32.totalorder %s56_s9, %s428_s0  ;;  %p434_p3 = scmp.lt.s32.totalorder %s428_s0, %s428_s0 }
  0x29   :  { %p435_p4 = por %p434_p3, %p433_p2 }
  0x2b   :  { %p436_p5 = pnand %p435_p4, %p429_p1 }
  0x2d   :  { %439 = shalt.err (!%p436_p5)
}
  0x2e   :  { %61 = dma.hbm_to_vmem [thread:$0]  %s546_s3, 2048, %s56_s9, [#allocation9], %s472_s28, %s472_s28, %s473_s29  }
  0x2f   :  { %460 = dma.done.wait [#allocation3], 256  }
  0x30   :  { %461 = vsyncadd [#allocation3], 4294967040 }
  0x31   :  { %462 = dma.done.wait [#allocation6], 256  }
  0x32   :  { %463 = vsyncadd [#allocation6], 4294967040 }
  0x33   :  { %464 = dma.done.wait [#allocation9], 2048  }
  0x34   :  { %465 = vsyncadd [#allocation9], 4294965248  ;;  %v476_v0 = vmov 0.0   ;;  %vm477_vm0 = vmmov 0   ;;  %v354_v1 = vld [vmem:[#allocation7] sm:$0xff]   ;;  %v355_v2 = vld [vmem:[#allocation5] sm:$0xff]  }
  0x35   :  { %300 = vmatprep.subr.bf16.mxu0 %v476_v0  ;;  %302 = vmatprep.mubr.msk.bf16.mxu0 %vm477_vm0, %v476_v0  ;;  %vm99_vm1 = vcmask 130048   ;;  %v161_v3 = vld [vmem:[#allocation8 + $0x78] sm:$0xff]  ;;  %v160_v4 = vld [vmem:[#allocation8 + $0x70] sm:$0xff]  ;;  %v159_v5 = vld [vmem:[#allocation8 + $0x68] sm:$0xff]  ;;  %v478_v21 = vmov 8  }
  0x36   :  { %301 = vmatpush3.bf16.msra.mxu0 %v354_v1  ;;  %306 = vmatprep.subr.mxu1 %v161_v3  ;;  %v158_v6 = vld [vmem:[#allocation8 + $0x60] sm:$0xff]  ;;  %v157_v8 = vld [vmem:[#allocation8 + $0x58] sm:$0xff]  ;;  %v156_v9 = vld [vmem:[#allocation8 + $0x50] sm:$0xff] }
  0x37   :  { %307 = vmatpush3.msra.mxu1 %v161_v3  ;;  %v144_v7 = vld [vmem:[#allocation2] sm:$0xff]  ;;  %v155_v10 = vld [vmem:[#allocation8 + $0x48] sm:$0xff]  ;;  %v153_v12 = vld [vmem:[#allocation8 + $0x38] sm:$0xff]  ;;  %353 = vset.pattern.permute.xlu0 %v478_v21 }
  0x38   :  { %308 = vmatprep.subr.mxu1 %v160_v4  ;;  %338 = vmatprep.mubr.f32.mxu1 %v144_v7  ;;  %v154_v11 = vld [vmem:[#allocation8 + $0x40] sm:$0xff]  ;;  %v152_v13 = vld [vmem:[#allocation8 + $0x30] sm:$0xff]  ;;  %v151_v14 = vld [vmem:[#allocation8 + $0x28] sm:$0xff] }
  0x39   :  { %303 = vmatmul.mubr.msk.bf16.vlgmr.msra.gmra.mxu0 %vm99_vm1, %v355_v2  ;;  %309 = vmatpush3.msra.mxu1 %v160_v4  ;;  %v150_v15 = vld [vmem:[#allocation8 + $0x20] sm:$0xff]  ;;  %v149_v16 = vld [vmem:[#allocation8 + $0x18] sm:$0xff]  ;;  %v148_v17 = vld [vmem:[#allocation8 + $0x10] sm:$0xff] }
  0x3a   :  { %310 = vmatprep.subr.mxu1 %v159_v5  ;;  %v147_v18 = vld [vmem:[#allocation8 + $0x8] sm:$0xff]  ;;  %v146_v19 = vld [vmem:[#allocation8] sm:$0xff] }
  0x3b   :  { %311 = vmatpush3.msra.mxu1 %v159_v5  ;;  %v145_v20 = vld [vmem:[#allocation2 + $0x8] sm:$0xff]  ;;  %v276_v22 = vld [vmem:[%s547_s4] ss:$0 sm:$0xff]  ;;  %s479_s4 = smov [#allocation10]  }
  0x3c   :  { %312 = vmatprep.subr.mxu1 %v158_v6  ;;  %s262_s15 = sshll.u32 %s479_s4, 4  ;;  %s263_s15 = int_to_ptr.vmem [resolvable:$true] %s262_s15 }
  0x3d   :  { %313 = vmatpush3.msra.mxu1 %v158_v6  ;;  %s440_s16 = scalar_lea.vmem %s263_s15, 256  ;;  %p445_p7 = scmp.lt.s32.totalorder %s263_s15, %s263_s15 }
  0x3e   :  { %314 = vmatprep.subr.mxu1 %v157_v8  ;;  %p441_p6 = scmp.ne.s32.totalorder %s263_s15, %s440_s16  ;;  %p446_p8 = scmp.lt.s32.totalorder %s440_s16, %s440_s16 }
  0x3f   :  { %315 = vmatpush3.msra.mxu1 %v157_v8 }
  0x40   :  { %316 = vmatprep.subr.mxu1 %v156_v9  ;;  %p447_p9 = por %p446_p8, %p445_p7 }
  0x41   :  { %317 = vmatpush3.msra.mxu1 %v156_v9 }
  0x42   :  { %318 = vmatprep.subr.mxu1 %v155_v10  ;;  %p448_p10 = pnand %p447_p9, %p441_p6 }
  0x43   :  { %319 = vmatpush3.msra.mxu1 %v155_v10 }
  0x44   :  { %320 = vmatprep.subr.mxu1 %v154_v11 }
  0x45   :  { %321 = vmatpush3.msra.mxu1 %v154_v11 }
  0x46   :  { %322 = vmatprep.subr.mxu1 %v153_v12 }
  0x47   :  { %323 = vmatpush3.msra.mxu1 %v153_v12 }
  0x48   :  { %324 = vmatprep.subr.mxu1 %v152_v13 }
  0x49   :  { %325 = vmatpush3.msra.mxu1 %v152_v13 }
  0x4a   :  { %326 = vmatprep.subr.mxu1 %v151_v14 }
  0x4b   :  { %327 = vmatpush3.msra.mxu1 %v151_v14 }
  0x4c   :  { %328 = vmatprep.subr.mxu1 %v150_v15 }
  0x4d   :  { %329 = vmatpush3.msra.mxu1 %v150_v15 }
  0x4e   :  { %330 = vmatprep.subr.mxu1 %v149_v16 }
  0x4f   :  { %331 = vmatpush3.msra.mxu1 %v149_v16 }
  0x50   :  { %332 = vmatprep.subr.mxu1 %v148_v17 }
  0x51   :  { %333 = vmatpush3.msra.mxu1 %v148_v17 }
  0x52   :  { %334 = vmatprep.subr.mxu1 %v147_v18 }
  0x53   :  { %335 = vmatpush3.msra.mxu1 %v147_v18 }
  0x54   :  { %336 = vmatprep.subr.mxu1 %v146_v19 }
  0x55   :  { %337 = vmatpush3.msra.mxu1 %v146_v19 }
  0x56   :  { %339 = vmatmul.mubr.f32.vlgmr.msra.gmra.mxu1 %v145_v20 }
  0xf9   :  { %v137_v23 = vpop.f32.mrf.mxu0 }
  0xfa   :  { %v138_v24 = vadd.f32 %v276_v22, %v137_v23 }
  0xfb   :  { %v304_v25 = vpop.f32.mrf.mxu0 }
  0xfc   :  { %356 = vtanh.f32 %v138_v24 }
  0xfd   :  { %v140_v26 = vpop.f32.mrf.mxu0 }
  0xfe   :  { %v141_v27 = vadd.f32 %v276_v22, %v140_v26 }
  0xff   :  { %v305_v28 = vpop.f32.mrf.mxu0 }
 0x100   :  { %358 = vtanh.f32 %v141_v27 }
 0x109   :  { %v357_v29 = vpop.eup %356 }
 0x10a   :  { %241 = vperm.xlu0 %353, %v357_v29  }
 0x10d   :  { %v359_v30 = vpop.eup %358 }
 0x10e   :  { %246 = vperm.xlu0 %353, %v359_v30  }
 0x116   :  { %v340_v31 = vpop.f32.mrf.mxu1 }
 0x118   :  { %v228_v34 = vpop.f32.mrf.mxu1 }
 0x185   :  { %v242_v32 = vpop.permute.xlu0 %241 }
 0x186   :  { %v249_v33 = vmul.f32 %v242_v32, %v144_v7 }
 0x188   :  { %v251_v35 = vadd.f32 %v249_v33, %v138_v24 }
 0x189   :  { %v247_v36 = vpop.permute.xlu0 %246 }
 0x18a   :  { %v253_v37 = vadd.f32 %v251_v35, %v228_v34  ;;  %v250_v38 = vmul.f32 %v247_v36, %v145_v20 }
 0x18c   :  { %255 = vst [vmem:[#allocation10] sm:$0xff] %v253_v37  ;;  %v252_v39 = vadd.f32 %v250_v38, %v141_v27 }
 0x18e   :  { %v254_v40 = vadd.f32 %v340_v31, %v252_v39 }
 0x190   :  { %256 = vst [vmem:[#allocation10 + $0x8] sm:$0xff] %v254_v40 }
 0x191   :  { %451 = shalt.err (!%p448_p10)
}
 0x192   :  { %268 = dma.vmem_to_hbm [thread:$0]  %s263_s15, 256, %s548_s5, [#allocation4], %s472_s28, %s472_s28, %s473_s29  }
 0x193   :  { %466 = dma.done.wait [#allocation4], 256  }
 0x194   :  { %467 = vsyncadd [#allocation4], 4294967040 }
 0x195   :  { %272 = vsyncpa [#allocation3], 1 }
 0x196   :  { %273 = vsyncpa [#allocation6], 1 }
 0x197   :  { %274 = vsyncpa [#allocation9], 1 }
 0x198   :  { %275 = vsyncpa [#allocation4], 1 }

</bundles_post_ra>
